<compile_context>
chip_gen: v6e
topology: v6e:2x2x1
jax: 0.10.0
libtpu: 0.0.40
codegen_flags: <defaults>
</compile_context>

<pallas_src>
import jax
import jax.numpy as jnp
from jax import lax
from jax.experimental import pallas as pl
from jax.experimental.pallas import tpu as pltpu


def _attention_kernel(q_ref, k_ref, v_ref, o_ref):
    """Grid = (Dv blocks [parallel], KV blocks [arbitrary]).

    Q (M, D) and the (M, tdv) f32 output block stay resident in VMEM while
    K/V stream through double-buffered BlockSpec DMA over the KV axis.  The
    dim-0 (over M) softmax is exact because M is never split.
    """
    j = pl.program_id(1)  # KV / N axis (inner, sequential)

    @pl.when(j == 0)
    def _():
        # Resident output block doubles as the f32 accumulator.
        o_ref[...] = jnp.zeros_like(o_ref)

    q = q_ref[...]          # (M, D)    native dtype -> MXU
    k = k_ref[...]          # (tn, D)
    v = v_ref[...]          # (tn, tdv)

    # S_tile = Q @ K_tile^T: contract the last dims directly (no K transpose
    # / XLU relayout), f32 accumulation on the MXU.
    s = lax.dot_general(
        q, k,
        dimension_numbers=(((1,), (1,)), ((), ())),
        preferred_element_type=jnp.float32,
    )  # (M, tn) f32

    # torch.softmax(S, dim=0, dtype=torch.float): per-column softmax over M.
    # Exact within this KV tile because columns never cross tiles and M is
    # fully resident.  Exact reciprocal (previous approx path caused the
    # numerical mismatch; the (1, tn) divide costs ~nothing).
    m = jnp.max(s, axis=0, keepdims=True)
    e = jnp.exp(s - m)
    p = e / jnp.sum(e, axis=0, keepdims=True)

    # Accumulate P_tile @ V_tile directly into the resident output block.
    # p is cast to V's dtype so a bf16 V gives a native bf16 MXU matmul.
    o_ref[...] += lax.dot_general(
        p.astype(v.dtype), v,
        dimension_numbers=(((1,), (0,)), ((), ())),
        preferred_element_type=jnp.float32,
    )


def _pick_kv_tile(M, D, tdv, itemsize, budget=48 << 20):
    """Largest KV tile whose VMEM footprint (resident Q + double-buffered
    output block, double-buffered K/V tiles, ~3 live (M, tn) f32 softmax
    intermediates) fits a budget sized conservatively for v7x's 64 MiB."""
    fixed = 2 * M * D * itemsize + 2 * M * tdv * 4
    for tn in (512, 256, 128):
        streamed = 2 * tn * (D + tdv) * itemsize
        interm = 3 * M * tn * 4
        if fixed + streamed + interm <= budget:
            return tn
    return 128


def attention(Q, K, V, *, tn=None, compute_dtype=None):
    """softmax(Q @ K.T, dim=0, float32) @ V.

    compute_dtype: optionally cast Q/K/V (e.g. jnp.bfloat16) so the MXU runs
    at native bf16 rate and streamed K/V HBM bytes halve; accumulation stays
    f32.  Default (None) keeps the input dtype.
    For best lane utilization, fuse heads so D and Dv are multiples of 128.
    """
    M, D = Q.shape
    N, Dk = K.shape
    Nv, Dv = V.shape
    assert D == Dk and N == Nv

    if compute_dtype is not None:
        Q = Q.astype(compute_dtype)
        K = K.astype(compute_dtype)
        V = V.astype(compute_dtype)
    itemsize = Q.dtype.itemsize

    # Optional Dv split -> leading "parallel" grid axis so v7x's second
    # TensorCore gets independent work (each half recomputes S + softmax;
    # only worthwhile for wide fused-head Dv).
    if Dv >= 512 and Dv % 256 == 0:
        tdv = Dv // 2
    else:
        tdv = Dv
    n_dv = Dv // tdv

    if tn is None:
        tn = _pick_kv_tile(M, D, tdv, itemsize)
    if N <= tn:
        tn = N                      # single full-extent KV block (valid: equals full dim)
        n_pad = N
    else:
        n_pad = pl.cdiv(N, tn) * tn
    if n_pad != N:
        # Zero-pad K/V rows: padded key columns pick up softmax weight but
        # multiply zero V rows, contributing exactly 0; real columns'
        # dim-0 softmax is untouched.  Keeps (8,128)-aligned streamed tiles.
        K = jnp.pad(K, ((0, n_pad - N), (0, 0)))
        V = jnp.pad(V, ((0, n_pad - N), (0, 0)))
    n_steps = n_pad // tn

    # Explicit scoped-VMEM limit from the actual footprint (+50% headroom),
    # clamped to v7x's 64 MiB physical VMEM.
    fixed = 2 * M * D * itemsize + 2 * M * tdv * 4
    streamed = 2 * tn * (D + tdv) * itemsize
    interm = 4 * M * tn * 4
    vmem_limit = int(1.5 * (fixed + streamed + interm)) + (4 << 20)
    vmem_limit = max(16 << 20, min(vmem_limit, 64 << 20))

    grid_spec = pltpu.PrefetchScalarGridSpec(
        num_scalar_prefetch=0,
        grid=(n_dv, n_steps),
        in_specs=[
            pl.BlockSpec((M, D), lambda d, j: (0, 0)),      # Q resident
            pl.BlockSpec((tn, D), lambda d, j: (j, 0)),     # K streamed (double-buffered)
            pl.BlockSpec((tn, tdv), lambda d, j: (j, d)),   # V streamed (double-buffered)
        ],
        out_specs=pl.BlockSpec((M, tdv), lambda d, j: (0, d)),  # resident f32 accumulator
    )

    return pl.pallas_call(
        _attention_kernel,
        out_shape=jax.ShapeDtypeStruct((M, Dv), jnp.float32),
        grid_spec=grid_spec,
        compiler_params=pltpu.CompilerParams(
            # Dv axis is embarrassingly parallel (v7x megacore); the KV axis
            # carries the output accumulator -> must stay sequential.
            dimension_semantics=("parallel", "arbitrary"),
            vmem_limit_bytes=vmem_limit,
        ),
    )(Q, K, V)


def _reference(Q, K, V):
    s = Q.astype(jnp.float32) @ K.astype(jnp.float32).T
    p = jax.nn.softmax(s, axis=0)
    return p @ V.astype(jnp.float32)


if __name__ == "__main__":
    key = jax.random.PRNGKey(0)
    kq, kk, kv = jax.random.split(key, 3)
    M, N, D, Dv = 8, 20, 32, 32          # small seq / hidden sizes
    Q = jax.random.normal(kq, (M, D), dtype=jnp.float32)
    K = jax.random.normal(kk, (N, D), dtype=jnp.float32)
    V = jax.random.normal(kv, (N, Dv), dtype=jnp.float32)

    ref = _reference(Q, K, V)

    # Default path: N fits in one resident KV block.
    out = attention(Q, K, V)
    jax.block_until_ready(out)
    assert out.shape == (M, Dv)
    assert jnp.allclose(out, ref, atol=2e-3, rtol=2e-3), "mismatch (single block)"

    # Streaming path: explicit small KV tile (N=20 -> zero-padded to 24,
    # 3 grid steps), exercising the resident-output accumulation + padding.
    out_tiled = attention(Q, K, V, tn=8)
    jax.block_until_ready(out_tiled)
    assert jnp.allclose(out_tiled, ref, atol=2e-3, rtol=2e-3), "mismatch (tiled)"

    print("KERNEL_OK")
</pallas_src>

<mosaic_0001>
module attributes {stable_mosaic.version = 11 : i64} {
  func.func @_attention_kernel(%arg0: i32, %arg1: i32, %arg2: memref<8x32xf32, #tpu.memory_space<vmem>>, %arg3: memref<20x32xf32, #tpu.memory_space<vmem>>, %arg4: memref<20x32xf32, #tpu.memory_space<vmem>>, %arg5: memref<8x32xf32, #tpu.memory_space<vmem>>) attributes {dimension_semantics = [#tpu.dimension_semantics<parallel>, #tpu.dimension_semantics<arbitrary>], iteration_bounds = array<i64: 1, 1>, scalar_prefetch = 0 : i64, scratch_operands = 0 : i64, tpu.core_type = #tpu.core_type<tc>, window_params = [{pipeline_mode = #tpu.pipeline_mode<synchronous>, transform_indices = @transform_0, window_bounds = array<i64: 8, 32>}, {transform_indices = @transform_1, window_bounds = array<i64: 20, 32>}, {transform_indices = @transform_2, window_bounds = array<i64: 20, 32>}, {transform_indices = @transform_3, window_bounds = array<i64: 8, 32>}]} {
    %c0_i32 = arith.constant 0 : i32
    %0 = arith.cmpi eq, %arg1, %c0_i32 : i32
    %1 = arith.extui %0 : i1 to i32
    %c0_i32_0 = arith.constant 0 : i32
    %2 = arith.cmpi ne, %1, %c0_i32_0 : i32
    scf.if %2 {
      %cst_13 = arith.constant 0.000000e+00 : f32
      %20 = vector.broadcast %cst_13 : f32 to vector<8x32xf32>
      %c0_14 = arith.constant 0 : index
      %c0_15 = arith.constant 0 : index
      %21 = vector.load %arg5[%c0_14, %c0_15] : memref<8x32xf32, #tpu.memory_space<vmem>>, vector<8x32xf32>
      tpu.vector_store %arg5[%c0_14, %c0_15], %20 {strides = array<i32>} : memref<8x32xf32, #tpu.memory_space<vmem>>, vector<8x32xf32>,
    } else {
    }
    %c0 = arith.constant 0 : index
    %c0_1 = arith.constant 0 : index
    %3 = vector.load %arg2[%c0, %c0_1] : memref<8x32xf32, #tpu.memory_space<vmem>>, vector<8x32xf32>
    %c0_2 = arith.constant 0 : index
    %c0_3 = arith.constant 0 : index
    %4 = vector.load %arg3[%c0_2, %c0_3] : memref<20x32xf32, #tpu.memory_space<vmem>>, vector<20x32xf32>
    %c0_4 = arith.constant 0 : index
    %c0_5 = arith.constant 0 : index
    %5 = vector.load %arg4[%c0_4, %c0_5] : memref<20x32xf32, #tpu.memory_space<vmem>>, vector<20x32xf32>
    %cst = arith.constant dense<0.000000e+00> : vector<8x20xf32>
    %6 = tpu.matmul %3, %4, %cst {dimension_numbers = #tpu.dot_dimension_numbers<[1], [1], [0], [0], [0, 0, 1, 0], [], []>} : vector<8x32xf32>, vector<20x32xf32>, vector<8x20xf32> -> vector<8x20xf32>
    %cst_6 = arith.constant dense<0xFF800000> : vector<20xf32>
    %7 = vector.multi_reduction <maximumf>, %6, %cst_6 [0] : vector<8x20xf32> to vector<20xf32>
    %8 = vector.shape_cast %7 : vector<20xf32> to vector<1x20xf32>
    %9 = vector.broadcast %8 : vector<1x20xf32> to vector<8x20xf32>
    %10 = arith.subf %6, %9 : vector<8x20xf32>
    %11 = math.exp %10 : vector<8x20xf32>
    %cst_7 = arith.constant dense<0.000000e+00> : vector<20xf32>
    %12 = vector.multi_reduction <add>, %11, %cst_7 [0] : vector<8x20xf32> to vector<20xf32>
    %13 = vector.shape_cast %12 : vector<20xf32> to vector<1x20xf32>
    %14 = vector.broadcast %13 : vector<1x20xf32> to vector<8x20xf32>
    %15 = arith.divf %11, %14 : vector<8x20xf32>
    %c0_8 = arith.constant 0 : index
    %c0_9 = arith.constant 0 : index
    %16 = vector.load %arg5[%c0_8, %c0_9] : memref<8x32xf32, #tpu.memory_space<vmem>>, vector<8x32xf32>
    %cst_10 = arith.constant dense<0.000000e+00> : vector<8x32xf32>
    %17 = tpu.matmul %15, %5, %cst_10 {dimension_numbers = #tpu.dot_dimension_numbers<[1], [0], [0], [1], [0, 0, 1, 1], [], []>} : vector<8x20xf32>, vector<20x32xf32>, vector<8x32xf32> -> vector<8x32xf32>
    %18 = arith.addf %16, %17 : vector<8x32xf32>
    %c0_11 = arith.constant 0 : index
    %c0_12 = arith.constant 0 : index
    %19 = vector.load %arg5[%c0_11, %c0_12] : memref<8x32xf32, #tpu.memory_space<vmem>>, vector<8x32xf32>
    tpu.vector_store %arg5[%c0_11, %c0_12], %18 {strides = array<i32>} : memref<8x32xf32, #tpu.memory_space<vmem>>, vector<8x32xf32>,
    return
  }
  func.func @transform_0(%arg0: i32, %arg1: i32) -> (i32, i32) {
    %c0_i32 = arith.constant 0 : i32
    %c0_i32_0 = arith.constant 0 : i32
    %c0_i32_1 = arith.constant 0 : i32
    return %c0_i32, %c0_i32_0 : i32, i32
  }
  func.func @transform_1(%arg0: i32, %arg1: i32) -> (i32, i32) {
    %c0_i32 = arith.constant 0 : i32
    %c0_i32_0 = arith.constant 0 : i32
    return %arg1, %c0_i32 : i32, i32
  }
  func.func @transform_2(%arg0: i32, %arg1: i32) -> (i32, i32) {
    %c0_i32 = arith.constant 0 : i32
    return %arg1, %arg0 : i32, i32
  }
  func.func @transform_3(%arg0: i32, %arg1: i32) -> (i32, i32) {
    %c0_i32 = arith.constant 0 : i32
    %c0_i32_0 = arith.constant 0 : i32
    return %c0_i32, %arg0 : i32, i32
  }
}

</mosaic_0001>

<bundles_post_ra>
// kernel: tpu_custom_call.1
= control target key start
LH: loop header
LB: loop body
LE: loop exit
PB: predicated region body
PF: predicated region fallthrough
CT: control target
= control target key end

     0   :  { %8 = vsyncpa [#allocation3], 0  ;;  %s445_s0 = inlined_call_operand.hbm [shape: f32[8,32], index: 0, kind: input, shape index: {}]   ;;  %s446_s1 = inlined_call_operand.hbm [shape: f32[20,32], index: 1, kind: input, shape index: {}]   ;;  %s447_s2 = inlined_call_operand.hbm [shape: f32[20,32], index: 2, kind: input, shape index: {}]   ;;  %s448_s3 = inlined_call_operand.hbm [shape: f32[8,32], index: 3, kind: output, shape index: {}]  }
   0x1   :  { %9 = vsyncpa [#allocation6], 0 }
   0x2   :  { %10 = vsyncpa [#allocation4], 0  ;;  %s396_s12 = smov [#allocation5]  }
   0x3   :  { %s26_s13 = sshll.u32 %s396_s12, 4  ;;  %s27_s13 = int_to_ptr.vmem [resolvable:$true] %s26_s13 }
   0x4   :  { %s318_s14 = scalar_lea.vmem %s27_s13, 384  ;;  %p323_p1 = scmp.lt.s32.totalorder %s27_s13, %s27_s13 }
   0x5   :  { %p319_p0 = scmp.ne.s32.totalorder %s27_s13, %s318_s14  ;;  %p324_p2 = scmp.lt.s32.totalorder %s318_s14, %s318_s14 }
   0x7   :  { %p325_p3 = por %p324_p2, %p323_p1 }
   0x9   :  { %p326_p4 = pnand %p325_p3, %p319_p0 }
   0xb   :  { %329 = shalt.err (!%p326_p4)
}
   0xc   :  { %s397_s15 = smov 128   ;;  %s398_s16 = smov 8  }
   0xd   :  { %32 = dma.hbm_to_vmem [thread:$0]  %s446_s1, 384, %s27_s13, [#allocation6], %s397_s15, %s397_s15, %s398_s16  }
   0xe   :  { %s399_s19 = smov [#allocation2]   ;;  %s400_s21 = smov [#allocation7]  }
   0xf   :  { %s17_s20 = sshll.u32 %s399_s19, 4  ;;  %s38_s22 = sshll.u32 %s400_s21, 4  ;;  %s18_s20 = int_to_ptr.vmem [resolvable:$true] %s17_s20  ;;  %s39_s22 = int_to_ptr.vmem [resolvable:$true] %s38_s22 }
  0x10   :  { %s338_s23 = scalar_lea.vmem %s18_s20, 128  ;;  %p343_p6 = scmp.lt.s32.totalorder %s18_s20, %s18_s20 }
  0x11   :  { %p339_p5 = scmp.ne.s32.totalorder %s18_s20, %s338_s23  ;;  %p344_p7 = scmp.lt.s32.totalorder %s338_s23, %s338_s23 }
  0x13   :  { %p345_p8 = por %p344_p7, %p343_p6 }
  0x15   :  { %p346_p9 = pnand %p345_p8, %p339_p5 }
  0x17   :  { %349 = shalt.err (!%p346_p9)
}
  0x18   :  { %20 = dma.hbm_to_vmem [thread:$0]  %s445_s0, 128, %s18_s20, [#allocation3]  }
  0x19   :  { %s358_s26 = scalar_lea.vmem %s39_s22, 384  ;;  %p363_p11 = scmp.lt.s32.totalorder %s39_s22, %s39_s22 }
  0x1a   :  { %p359_p10 = scmp.ne.s32.totalorder %s39_s22, %s358_s26  ;;  %p364_p12 = scmp.lt.s32.totalorder %s358_s26, %s358_s26 }
  0x1c   :  { %p365_p13 = por %p364_p12, %p363_p11 }
  0x1e   :  { %p366_p0 = pnand %p365_p13, %p359_p10 }
  0x20   :  { %369 = shalt.err (!%p366_p0)
}
  0x21   :  { %44 = dma.hbm_to_vmem [thread:$0]  %s447_s2, 384, %s39_s22, [#allocation6], %s397_s15, %s397_s15, %s398_s16  }
  0x22   :  { %390 = dma.done.wait [#allocation3], 128  }
  0x23   :  { %391 = vsyncadd [#allocation3], 4294967168 }
  0x24   :  { %392 = dma.done.wait [#allocation6], 768  }
  0x25   :  { %393 = vsyncadd [#allocation6], 4294966528  ;;  %vm58_vm0 = vcmask 261120   ;;  %v401_v0 = vmov 0.0   ;;  %vm402_vm1 = vmmov 0   ;;  %v62_v2 = vld [vmem:[#allocation5 + $0x8] sm:$0xff] }
  0x26   :  { %59 = vst.msk [vmem:[#allocation8] sm:$0xff] %vm58_vm0, %v401_v0  ;;  %280 = vmatprep.subr.mxu0 %v401_v0  ;;  %286 = vmatprep.mubr.msk.f32.mxu0 %vm402_vm1, %v401_v0  ;;  %v63_v1 = vld [vmem:[#allocation5 + $0x10] sm:$0xf]  ;;  %v61_v3 = vld [vmem:[#allocation5] sm:$0xff]  ;;  %v60_v4 = vld [vmem:[#allocation2] sm:$0xff]  ;;  %vm174_vm2 = vcmask 1043456  }
  0x27   :  { %289 = vmatprep.subr.mxu1 %v401_v0  ;;  %295 = vmatprep.mubr.msk.f32.mxu1 %vm402_vm1, %v401_v0  ;;  %v66_v5 = vld [vmem:[#allocation7 + $0x10] sm:$0xf]  ;;  %v65_v6 = vld [vmem:[#allocation7 + $0x8] sm:$0xff]  ;;  %v64_v7 = vld [vmem:[#allocation7] sm:$0xff]  ;;  %vm150_vm3 = vcmask 162816   ;;  %s403_s0 = smov [#allocation8]  }
  0x28   :  { %281 = vmatpush3.xpose.msk.msra.mxu0 %vm58_vm0, %v63_v1  ;;  %290 = vmatpush3.msk.msra.mxu1 %vm174_vm2, %v66_v5  ;;  %s256_s2 = sshll.u32 %s403_s0, 4  ;;  %s257_s2 = int_to_ptr.vmem [resolvable:$true] %s256_s2 }
  0x29   :  { %282 = vmatprep.subr.mxu0 %v401_v0  ;;  %291 = vmatprep.subr.mxu1 %v401_v0  ;;  %s370_s28 = scalar_lea.vmem %s257_s2, 128  ;;  %p375_p2 = scmp.lt.s32.totalorder %s257_s2, %s257_s2 }
  0x2a   :  { %292 = vmatpush3.msra.mxu1 %v65_v6  ;;  %p371_p1 = scmp.ne.s32.totalorder %s257_s2, %s370_s28  ;;  %p376_p3 = scmp.lt.s32.totalorder %s370_s28, %s370_s28 }
  0x2b   :  { %293 = vmatprep.subr.mxu1 %v401_v0 }
  0x2c   :  { %283 = vmatpush3.xpose.msk.msra.mxu0 %vm58_vm0, %v62_v2  ;;  %294 = vmatpush3.msra.mxu1 %v64_v7  ;;  %p377_p4 = por %p376_p3, %p375_p2 }
  0x2d   :  { %284 = vmatprep.subr.mxu0 %v401_v0  ;;  %v170_v29 = vld [vmem:[#allocation8] sm:$0xff] }
  0x2e   :  { %p378_p5 = pnand %p377_p4, %p371_p1 }
  0x30   :  { %285 = vmatpush3.xpose.msk.msra.mxu0 %vm58_vm0, %v61_v3 }
  0x33   :  { %287 = vmatmul.mubr.msk.f32.vlgmr.msra.gmra.mxu0 %vm58_vm0, %v60_v4 }
  0xf3   :  { %v146_v8 = vpop.f32.mrf.mxu0 }
  0xf4   :  { %v151_v9 = vsel %vm150_vm3, %v146_v8, -inf }
  0xf5   :  { %v152_v10 = vrot.slane %v151_v9, 4  ;;  %v288_v11 = vpop.f32.mrf.mxu0 }
  0xf7   :  { %v153_v12 = vmax.f32 %v151_v9, %v152_v10 }
  0xf9   :  { %v154_v13 = vrot.slane %v153_v12, 2 }
  0xfb   :  { %v155_v14 = vmax.f32 %v153_v12, %v154_v13 }
  0xfd   :  { %v156_v15 = vrot.slane %v155_v14, 1 }
  0xff   :  { %v157_v16 = vmax.f32 %v155_v14, %v156_v15 }
 0x101   :  { %v158_v17 = vsub.f32 %v146_v8, %v157_v16 }
 0x103   :  { %v159_v18 = vmul.f32 1.442695, %v158_v17 }
 0x105   :  { %306 = vpow2.f32 %v159_v18 }
 0x112   :  { %v307_v19 = vpop.eup %306 }
 0x113   :  { %v161_v20 = vsel %vm150_vm3, %v307_v19, 0.0 }
 0x114   :  { %v162_v21 = vrot.slane %v161_v20, 4 }
 0x116   :  { %v163_v22 = vadd.f32 %v162_v21, %v161_v20 }
 0x118   :  { %v164_v23 = vrot.slane %v163_v22, 2 }
 0x11a   :  { %v165_v24 = vadd.f32 %v164_v23, %v163_v22 }
 0x11c   :  { %v166_v25 = vrot.slane %v165_v24, 1 }
 0x11e   :  { %v167_v26 = vadd.f32 %v166_v25, %v165_v24 }
 0x120   :  { %308 = vrcp.f32 %v167_v26 }
 0x12d   :  { %v309_v27 = vpop.eup %308 }
 0x12e   :  { %v169_v28 = vmul.f32 %v309_v27, %v307_v19 }
 0x130   :  { %296 = vmatmul.mubr.msk.f32.vlgmr.msra.gmra.mxu1 %vm150_vm3, %v169_v28 }
 0x1f0   :  { %v244_v30 = vpop.f32.mrf.mxu1 }
 0x1f1   :  { %v248_v31 = vadd.f32 %v244_v30, %v170_v29 }
 0x1f2   :  { %v297_v32 = vpop.f32.mrf.mxu1 }
 0x1f3   :  { %249 = vst.msk [vmem:[#allocation8] sm:$0xff] %vm58_vm0, %v248_v31 }
 0x1f4   :  { %381 = shalt.err (!%p378_p5)
}
 0x1f5   :  { %259 = dma.vmem_to_hbm [thread:$0]  %s257_s2, 128, %s448_s3, [#allocation4]  }
 0x1f6   :  { %394 = dma.done.wait [#allocation4], 128  }
 0x1f7   :  { %395 = vsyncadd [#allocation4], 4294967168 }
 0x1f8   :  { %263 = vsyncpa [#allocation3], 1 }
 0x1f9   :  { %264 = vsyncpa [#allocation6], 1 }
 0x1fa   :  { %265 = vsyncpa [#allocation4], 1 }

</bundles_post_ra>
